<compile_context>
chip_gen: v7x
topology: tpu7x:2x2x1
jax: 0.10.0
libtpu: 0.0.40
codegen_flags: <defaults>
</compile_context>

<pallas_src>
import jax
import jax.numpy as jnp
from jax.experimental import pallas as pl
from jax.experimental.pallas import tpu as pltpu

BN_EPS = 1e-5

INPUT_SIZE = 2
HIDDEN1 = 100
HIDDEN2 = 100
OUTPUT_SIZE = 1

LANES = 128            # padded feature width for hidden tiles
MAX_BATCH_TILE = 2048  # rows per grid step (VMEM use stays tiny; sweepable)
MIN_SPLIT_ROWS = 128   # if B >= 2*this, force >= 2 grid steps (v7x: 2 TCs)
BATCH_ALIGN = 16       # bf16 sublane packing -> keep row tiles multiples of 16


# ---------------------------------------------------------------------------
# Kernel
# ---------------------------------------------------------------------------
def _mlp_kernel(x_ref, w1_ref, b1_ref, w2_ref, b2_ref, w3_ref, b3_ref, o_ref):
    x = x_ref[...]                                   # (TB, 2) f32

    # ---- fc1 (+ folded bn1) + relu: K=2 -> two rank-1 FMAs on the VPU ----
    h = (x[:, 0:1] * w1_ref[0:1, :]
         + x[:, 1:2] * w1_ref[1:2, :]
         + b1_ref[...])                              # (TB, 128) f32
    h = jnp.maximum(h, 0.0)
    # TODO(synk): Dropout(0.5) masking and batch-statistics BatchNorm are
    # training-mode only; this kernel implements eval-mode inference.

    # ---- fc2 (+ folded bn2) + relu: bf16 MXU matmul, f32 accumulation ----
    h = jnp.dot(h.astype(jnp.bfloat16), w2_ref[...],
                preferred_element_type=jnp.float32) + b2_ref[...]
    h = jnp.maximum(h, 0.0)                          # (TB, 128) f32

    # ---- fc3: single output column -> VPU multiply + XLU lane reduce ----
    out = jnp.sum(h * w3_ref[...], axis=-1, keepdims=True) + b3_ref[...]
    o_ref[...] = out.astype(o_ref.dtype)             # (TB, 1)


# ---------------------------------------------------------------------------
# Wrapper-side parameter folding / padding (call ONCE, reuse across forwards)
# ---------------------------------------------------------------------------
def _round_up(n, m):
    return ((n + m - 1) // m) * m


def _cdiv(a, b):
    return -(-a // b)


def _pad_to(a, shape):
    pads = [(0, t - s) for s, t in zip(a.shape, shape)]
    return jnp.pad(a, pads)


def _fold_bn(w, b, gamma, beta, mean, var, eps=BN_EPS):
    """Fold BatchNorm1d (running stats, affine) into a preceding Linear."""
    scale = gamma * jax.lax.rsqrt(var + eps)         # (1, out)
    return w * scale, (b - mean) * scale + beta


def prepare_params(p):
    """Fold BN into fc1/fc2, pad to lane-aligned shapes, cast fc2 to bf16."""
    w1, b1 = _fold_bn(p["w1"], p["b1"], p["g1"], p["beta1"], p["m1"], p["v1"])
    w2, b2 = _fold_bn(p["w2"], p["b2"], p["g2"], p["beta2"], p["m2"], p["v2"])
    w3, b3 = p["w3"], p["b3"]

    return dict(
        w1=_pad_to(w1, (INPUT_SIZE, LANES)).astype(jnp.float32),       # (2, 128)
        b1=_pad_to(b1, (1, LANES)).astype(jnp.float32),                # (1, 128)
        w2=_pad_to(w2, (LANES, LANES)).astype(jnp.bfloat16),           # (128, 128) bf16
        b2=_pad_to(b2, (1, LANES)).astype(jnp.float32),                # (1, 128)
        w3=_pad_to(w3.reshape(1, HIDDEN2), (1, LANES)).astype(jnp.float32),  # (1, 128)
        b3=b3.reshape(1, 1).astype(jnp.float32),                       # (1, 1)
    )


# ---------------------------------------------------------------------------
# Tiling & pallas_call wrapper
# ---------------------------------------------------------------------------
def _choose_tiling(B):
    n_tiles = max(1, _cdiv(B, MAX_BATCH_TILE))
    # v7x has 2 TensorCores; the "parallel" grid axis is what shards across them.
    if n_tiles == 1 and B >= 2 * MIN_SPLIT_ROWS:
        n_tiles = 2
    tb = _round_up(_cdiv(B, n_tiles), BATCH_ALIGN)
    n_tiles = _cdiv(B, tb)
    return tb, n_tiles * tb


def mlp_forward(x, fp):
    """x: (B, INPUT_SIZE) float32; fp: output of prepare_params().

    Returns (B, OUTPUT_SIZE) float32. Eval-mode semantics only.
    """
    B = x.shape[0]
    tb, b_pad = _choose_tiling(B)
    if b_pad != B:
        x = jnp.pad(x, ((0, b_pad - B), (0, 0)))
    grid = (b_pad // tb,)

    # Resident (non-tiled) parameter specs: same block for every grid step.
    def resident(shape):
        return pl.BlockSpec(shape, lambda i: (0, 0))

    out_padded = pl.pallas_call(
        _mlp_kernel,
        out_shape=jax.ShapeDtypeStruct((b_pad, OUTPUT_SIZE), jnp.float32),
        grid_spec=pltpu.PrefetchScalarGridSpec(
            num_scalar_prefetch=0,
            grid=grid,
            in_specs=[
                pl.BlockSpec((tb, INPUT_SIZE), lambda i: (i, 0)),   # x (batch-tiled)
                resident((INPUT_SIZE, LANES)),                      # w1  f32
                resident((1, LANES)),                               # b1  f32
                resident((LANES, LANES)),                           # w2  bf16
                resident((1, LANES)),                               # b2  f32
                resident((1, LANES)),                               # w3  f32 (row)
                resident((1, 1)),                                   # b3  f32
            ],
            out_specs=pl.BlockSpec((tb, OUTPUT_SIZE), lambda i: (i, 0)),
        ),
        compiler_params=pltpu.CompilerParams(
            dimension_semantics=("parallel",),
        ),
    )(x, fp["w1"], fp["b1"], fp["w2"], fp["b2"], fp["w3"], fp["b3"])

    return out_padded[:B]


# ---------------------------------------------------------------------------
# Parameters & pure-JAX reference
# ---------------------------------------------------------------------------
def init_params(key):
    """Deterministic synthetic parameters matching the PyTorch module's shapes.

    Linear weights are stored as (in_features, out_features) — the transpose of
    PyTorch's (out, in) layout — so the kernel computes x @ W directly.
    """
    ks = jax.random.split(key, 6)

    def linear(kw, kb, fan_in, fan_out):
        bound = 1.0 / jnp.sqrt(jnp.float32(fan_in))
        w = jax.random.uniform(kw, (fan_in, fan_out), jnp.float32, -bound, bound)
        b = jax.random.uniform(kb, (1, fan_out), jnp.float32, -bound, bound)
        return w, b

    w1, b1 = linear(ks[0], ks[1], INPUT_SIZE, HIDDEN1)
    w2, b2 = linear(ks[2], ks[3], HIDDEN1, HIDDEN2)
    w3, b3 = linear(ks[4], ks[5], HIDDEN2, OUTPUT_SIZE)

    # BatchNorm1d defaults: gamma=1, beta=0, running_mean=0, running_var=1.
    # (Perturb slightly so the BN fold is actually exercised.)
    kg1, kg2 = jax.random.split(ks[5])
    g1 = 1.0 + 0.1 * jax.random.normal(kg1, (1, HIDDEN1), jnp.float32)
    g2 = 1.0 + 0.1 * jax.random.normal(kg2, (1, HIDDEN2), jnp.float32)

    return dict(
        w1=w1, b1=b1,
        g1=g1,
        beta1=0.05 * jnp.ones((1, HIDDEN1), jnp.float32),
        m1=0.01 * jnp.ones((1, HIDDEN1), jnp.float32),
        v1=jnp.ones((1, HIDDEN1), jnp.float32),
        w2=w2, b2=b2,
        g2=g2,
        beta2=-0.05 * jnp.ones((1, HIDDEN2), jnp.float32),
        m2=-0.01 * jnp.ones((1, HIDDEN2), jnp.float32),
        v2=1.1 * jnp.ones((1, HIDDEN2), jnp.float32),
        w3=w3, b3=b3,
    )


def reference_forward(x, p):
    """Pure-JAX f32 reference (eval-mode semantics, unfolded params)."""
    h = x @ p["w1"] + p["b1"]
    h = (h - p["m1"]) * jax.lax.rsqrt(p["v1"] + BN_EPS) * p["g1"] + p["beta1"]
    h = jnp.maximum(h, 0.0)
    h = h @ p["w2"] + p["b2"]
    h = (h - p["m2"]) * jax.lax.rsqrt(p["v2"] + BN_EPS) * p["g2"] + p["beta2"]
    h = jnp.maximum(h, 0.0)
    return h @ p["w3"] + p["b3"]


if __name__ == "__main__":
    key = jax.random.PRNGKey(0)
    k_params, k_x = jax.random.split(key)

    params = init_params(k_params)
    prepared = prepare_params(params)          # fold/pad/cast once, reuse

    # Small single-tile batch.
    B = 8
    x = jax.random.normal(k_x, (B, INPUT_SIZE), jnp.float32)
    out = jax.block_until_ready(mlp_forward(x, prepared))
    ref = reference_forward(x, params)
    assert out.shape == (B, OUTPUT_SIZE)
    # fc2 runs in bf16 (f32 accumulation) -> loosened tolerance vs f32 reference.
    assert jnp.allclose(out, ref, atol=2e-2, rtol=2e-2), "mismatch vs JAX reference"

    # Ragged multi-tile batch (exercises padding + 2-step parallel grid).
    B2 = 300
    x2 = jax.random.normal(jax.random.fold_in(k_x, 1), (B2, INPUT_SIZE), jnp.float32)
    out2 = jax.block_until_ready(mlp_forward(x2, prepared))
    ref2 = reference_forward(x2, params)
    assert out2.shape == (B2, OUTPUT_SIZE)
    assert jnp.allclose(out2, ref2, atol=2e-2, rtol=2e-2), "mismatch vs JAX reference"

    print("KERNEL_OK")
</pallas_src>

<mosaic_0001>
module attributes {stable_mosaic.version = 11 : i64} {
  func.func @_mlp_kernel(%arg0: i32, %arg1: memref<16x2xf32, #tpu.memory_space<vmem>>, %arg2: memref<2x128xf32, #tpu.memory_space<vmem>>, %arg3: memref<1x128xf32, #tpu.memory_space<vmem>>, %arg4: memref<128x128xbf16, #tpu.memory_space<vmem>>, %arg5: memref<1x128xf32, #tpu.memory_space<vmem>>, %arg6: memref<1x128xf32, #tpu.memory_space<vmem>>, %arg7: memref<1x1xf32, #tpu.memory_space<vmem>>, %arg8: memref<16x1xf32, #tpu.memory_space<vmem>>) attributes {dimension_semantics = [#tpu.dimension_semantics<parallel>], iteration_bounds = array<i64: 1>, scalar_prefetch = 0 : i64, scratch_operands = 0 : i64, tpu.core_type = #tpu.core_type<tc>, window_params = [{transform_indices = @transform_0, window_bounds = array<i64: 16, 2>}, {pipeline_mode = #tpu.pipeline_mode<synchronous>, transform_indices = @transform_1, window_bounds = array<i64: 2, 128>}, {pipeline_mode = #tpu.pipeline_mode<synchronous>, transform_indices = @transform_2, window_bounds = array<i64: 1, 128>}, {pipeline_mode = #tpu.pipeline_mode<synchronous>, transform_indices = @transform_3, window_bounds = array<i64: 128, 128>}, {pipeline_mode = #tpu.pipeline_mode<synchronous>, transform_indices = @transform_4, window_bounds = array<i64: 1, 128>}, {pipeline_mode = #tpu.pipeline_mode<synchronous>, transform_indices = @transform_5, window_bounds = array<i64: 1, 128>}, {pipeline_mode = #tpu.pipeline_mode<synchronous>, transform_indices = @transform_6, window_bounds = array<i64: 1, 1>}, {transform_indices = @transform_7, window_bounds = array<i64: 16, 1>}]} {
    %c0 = arith.constant 0 : index
    %c0_0 = arith.constant 0 : index
    %0 = vector.load %arg1[%c0, %c0_0] : memref<16x2xf32, #tpu.memory_space<vmem>>, vector<16x2xf32>
    %1 = vector.extract_strided_slice %0 {offsets = [0, 0], sizes = [16, 1], strides = [1, 1]} : vector<16x2xf32> to vector<16x1xf32>
    %c0_1 = arith.constant 0 : index
    %c0_2 = arith.constant 0 : index
    %2 = vector.load %arg2[%c0_1, %c0_2] : memref<2x128xf32, #tpu.memory_space<vmem>>, vector<1x128xf32>
    %3 = vector.broadcast %1 : vector<16x1xf32> to vector<16x128xf32>
    %4 = vector.broadcast %2 : vector<1x128xf32> to vector<16x128xf32>
    %5 = arith.mulf %3, %4 : vector<16x128xf32>
    %6 = vector.extract_strided_slice %0 {offsets = [0, 1], sizes = [16, 1], strides = [1, 1]} : vector<16x2xf32> to vector<16x1xf32>
    %c1 = arith.constant 1 : index
    %c0_3 = arith.constant 0 : index
    %7 = vector.load %arg2[%c1, %c0_3] : memref<2x128xf32, #tpu.memory_space<vmem>>, vector<1x128xf32>
    %8 = vector.broadcast %6 : vector<16x1xf32> to vector<16x128xf32>
    %9 = vector.broadcast %7 : vector<1x128xf32> to vector<16x128xf32>
    %10 = arith.mulf %8, %9 : vector<16x128xf32>
    %11 = arith.addf %5, %10 : vector<16x128xf32>
    %c0_4 = arith.constant 0 : index
    %c0_5 = arith.constant 0 : index
    %12 = vector.load %arg3[%c0_4, %c0_5] : memref<1x128xf32, #tpu.memory_space<vmem>>, vector<1x128xf32>
    %13 = vector.broadcast %12 : vector<1x128xf32> to vector<16x128xf32>
    %14 = arith.addf %11, %13 : vector<16x128xf32>
    %cst = arith.constant 0.000000e+00 : f32
    %15 = vector.broadcast %cst : f32 to vector<16x128xf32>
    %16 = arith.maximumf %14, %15 : vector<16x128xf32>
    %17 = arith.truncf %16 : vector<16x128xf32> to vector<16x128xbf16>
    %c0_6 = arith.constant 0 : index
    %c0_7 = arith.constant 0 : index
    %18 = vector.load %arg4[%c0_6, %c0_7] : memref<128x128xbf16, #tpu.memory_space<vmem>>, vector<128x128xbf16>
    %cst_8 = arith.constant dense<0.000000e+00> : vector<16x128xf32>
    %19 = tpu.matmul %17, %18, %cst_8 {dimension_numbers = #tpu.dot_dimension_numbers<[1], [0], [0], [1], [0, 0, 1, 1], [], []>} : vector<16x128xbf16>, vector<128x128xbf16>, vector<16x128xf32> -> vector<16x128xf32>
    %c0_9 = arith.constant 0 : index
    %c0_10 = arith.constant 0 : index
    %20 = vector.load %arg5[%c0_9, %c0_10] : memref<1x128xf32, #tpu.memory_space<vmem>>, vector<1x128xf32>
    %21 = vector.broadcast %20 : vector<1x128xf32> to vector<16x128xf32>
    %22 = arith.addf %19, %21 : vector<16x128xf32>
    %cst_11 = arith.constant 0.000000e+00 : f32
    %23 = vector.broadcast %cst_11 : f32 to vector<16x128xf32>
    %24 = arith.maximumf %22, %23 : vector<16x128xf32>
    %c0_12 = arith.constant 0 : index
    %c0_13 = arith.constant 0 : index
    %25 = vector.load %arg6[%c0_12, %c0_13] : memref<1x128xf32, #tpu.memory_space<vmem>>, vector<1x128xf32>
    %26 = vector.broadcast %25 : vector<1x128xf32> to vector<16x128xf32>
    %27 = arith.mulf %24, %26 : vector<16x128xf32>
    %cst_14 = arith.constant dense<0.000000e+00> : vector<16xf32>
    %28 = vector.multi_reduction <add>, %27, %cst_14 [1] : vector<16x128xf32> to vector<16xf32>
    %29 = vector.shape_cast %28 : vector<16xf32> to vector<16x1xf32>
    %c0_15 = arith.constant 0 : index
    %c0_16 = arith.constant 0 : index
    %30 = vector.load %arg7[%c0_15, %c0_16] : memref<1x1xf32, #tpu.memory_space<vmem>>, vector<1x1xf32>
    %31 = vector.broadcast %30 : vector<1x1xf32> to vector<16x1xf32>
    %32 = arith.addf %29, %31 : vector<16x1xf32>
    %c0_17 = arith.constant 0 : index
    %c0_18 = arith.constant 0 : index
    %33 = vector.load %arg8[%c0_17, %c0_18] : memref<16x1xf32, #tpu.memory_space<vmem>>, vector<16x1xf32>
    tpu.vector_store %arg8[%c0_17, %c0_18], %32 {strides = array<i32>} : memref<16x1xf32, #tpu.memory_space<vmem>>, vector<16x1xf32>,
    return
  }
  func.func @transform_0(%arg0: i32) -> (i32, i32) {
    %c0_i32 = arith.constant 0 : i32
    %c0_i32_0 = arith.constant 0 : i32
    return %arg0, %c0_i32 : i32, i32
  }
  func.func @transform_1(%arg0: i32) -> (i32, i32) {
    %c0_i32 = arith.constant 0 : i32
    %c0_i32_0 = arith.constant 0 : i32
    %c0_i32_1 = arith.constant 0 : i32
    return %c0_i32, %c0_i32_0 : i32, i32
  }
  func.func @transform_2(%arg0: i32) -> (i32, i32) {
    %c0_i32 = arith.constant 0 : i32
    %c0_i32_0 = arith.constant 0 : i32
    %c0_i32_1 = arith.constant 0 : i32
    return %c0_i32, %c0_i32_0 : i32, i32
  }
  func.func @transform_3(%arg0: i32) -> (i32, i32) {
    %c0_i32 = arith.constant 0 : i32
    %c0_i32_0 = arith.constant 0 : i32
    %c0_i32_1 = arith.constant 0 : i32
    return %c0_i32, %c0_i32_0 : i32, i32
  }
  func.func @transform_4(%arg0: i32) -> (i32, i32) {
    %c0_i32 = arith.constant 0 : i32
    %c0_i32_0 = arith.constant 0 : i32
    %c0_i32_1 = arith.constant 0 : i32
    return %c0_i32, %c0_i32_0 : i32, i32
  }
  func.func @transform_5(%arg0: i32) -> (i32, i32) {
    %c0_i32 = arith.constant 0 : i32
    %c0_i32_0 = arith.constant 0 : i32
    %c0_i32_1 = arith.constant 0 : i32
    return %c0_i32, %c0_i32_0 : i32, i32
  }
  func.func @transform_6(%arg0: i32) -> (i32, i32) {
    %c0_i32 = arith.constant 0 : i32
    %c0_i32_0 = arith.constant 0 : i32
    %c0_i32_1 = arith.constant 0 : i32
    return %c0_i32, %c0_i32_0 : i32, i32
  }
  func.func @transform_7(%arg0: i32) -> (i32, i32) {
    %c0_i32 = arith.constant 0 : i32
    %c0_i32_0 = arith.constant 0 : i32
    return %arg0, %c0_i32 : i32, i32
  }
}

</mosaic_0001>

<bundles_post_ra>
// kernel: tpu_custom_call.1
= control target key start
LH: loop header
LB: loop body
LE: loop exit
PB: predicated region body
PF: predicated region fallthrough
CT: control target
= control target key end

     0   :  { %s409_s0 = inlined_call_operand.vmem [shape: f32[16,2], index: 0, kind: input, shape index: {}]   ;;  %s410_s1 = inlined_call_operand.vmem [shape: f32[2,128], index: 1, kind: input, shape index: {}]   ;;  %s411_s2 = inlined_call_operand.vmem [shape: f32[1,128], index: 2, kind: input, shape index: {}]   ;;  %s412_s3 = inlined_call_operand.hbm [shape: bf16[128,128], index: 3, kind: input, shape index: {}]   ;;  %s413_s4 = inlined_call_operand.vmem [shape: f32[1,128], index: 4, kind: input, shape index: {}]   ;;  %s414_s5 = inlined_call_operand.vmem [shape: f32[1,128], index: 5, kind: input, shape index: {}]   ;;  %s415_s6 = inlined_call_operand.<no memory space> [shape: f32[1,1], index: 6, kind: input, shape index: {}]   ;;  %s416_s7 = inlined_call_operand.vmem [shape: f32[16,1], index: 7, kind: output, shape index: {}]  }
   0x1   :  { %v12_v0 = vstv %s415_s6 }
   0x2   :  { %13 = vst [vmem:[#allocation2] sm:$0x1] %v12_v0 }
   0x3   :  { %14 = vsyncpa [#allocation4], 0  ;;  %s320_s26 = smov [#allocation3]   ;;  %s296_s30 = scalar_lea.hbm %s412_s3, 1024 }
   0x4   :  { %s26_s27 = sshll.u32 %s320_s26, 4  ;;  %p297_p0 = scmp.ne.s32.totalorder %s412_s3, %s296_s30  ;;  %s27_s27 = int_to_ptr.vmem [resolvable:$true] %s26_s27 }
   0x5   :  { %p300_p1 = scmp.lt.u32.totalorder %s296_s30, %s412_s3 }
   0x7   :  { %p302_p2 = pnand %p300_p1, %p297_p0 }
   0x9   :  { %305 = shalt.err (!%p302_p2)
}
   0xa   :  { %s306_s6 = scalar_lea.vmem %s27_s27, 1024  ;;  %p311_p4 = scmp.lt.s32.totalorder %s27_s27, %s27_s27 }
   0xb   :  { %p307_p3 = scmp.ne.s32.totalorder %s27_s27, %s306_s6  ;;  %p312_p5 = scmp.lt.s32.totalorder %s306_s6, %s306_s6 }
   0xd   :  { %p313_p6 = por %p312_p5, %p311_p4 }
   0xf   :  { %p314_p7 = pnand %p313_p6, %p307_p3 }
  0x11   :  { %317 = shalt.err (!%p314_p7)
}
  0x12   :  { %s321_s12 = smov 64   ;;  %s322_s13 = smov 4  }
  0x13   :  { %32 = dma.hbm_to_vmem [thread:$0]  %s412_s3, 1024, %s27_s27, [#allocation4], %s321_s12, %s321_s12, %s322_s13  }
  0x14   :  { %318 = dma.done.wait [#allocation4], 1024  }
  0x15   :  { %319 = vsyncadd [#allocation4], 4294966272  ;;  %v323_v1 = vmov 1   ;;  %v324_v2 = vmov 0   ;;  %v325_v3 = vmov 0.0   ;;  %v43_v4 = vld [vmem:[%s409_s0] sm:$0xff] }
  0x16   :  { %286 = vset.pattern.permute.xlu1 %v323_v1  ;;  %285 = vset.pattern.permute.xlu0 %v324_v2  ;;  %v288_v5 = vld [vmem:[#allocation3] sm:$0xff]   ;;  %v289_v7 = vld [vmem:[#allocation3 + $0x8] sm:$0xff]   ;;  %v290_v8 = vld [vmem:[#allocation3 + $0x10] sm:$0xff]   ;;  %vm326_vm0 = vmmov 0   ;;  %vm227_vm1 = vcmask 7168  }
  0x17   :  { %258 = vmatprep.subr.bf16.mxu0 %v325_v3  ;;  %64 = vperm.xlu1 %286, %v43_v4   ;;  %v44_v6 = vld [vmem:[%s409_s0 + $0x8] sm:$0xff]  ;;  %v291_v9 = vld [vmem:[#allocation3 + $0x18] sm:$0xff]   ;;  %v294_v12 = vld [vmem:[#allocation3 + $0x30] sm:$0xff]  }
  0x18   :  { %48 = vperm.xlu0 %285, %v43_v4   ;;  %259 = vmatpush3.bf16.msra.mxu0 %v288_v5  ;;  %v292_v10 = vld [vmem:[#allocation3 + $0x20] sm:$0xff]   ;;  %v293_v11 = vld [vmem:[#allocation3 + $0x28] sm:$0xff]   ;;  %v295_v13 = vld [vmem:[#allocation3 + $0x38] sm:$0xff]  }
  0x19   :  { %260 = vmatprep.subr.bf16.mxu0 %v325_v3  ;;  %274 = vmatprep.mubr.msk.bf16.mxu0 %vm326_vm0, %v325_v3  ;;  %v236_v14 = vld [vmem:[%s410_s1 + $0x1] ss:$0 sm:$0xff]  ;;  %v235_v15 = vld [vmem:[%s410_s1] ss:$0 sm:$0xff] }
  0x1a   :  { %v237_v21 = vld [vmem:[%s411_s2] ss:$0 sm:$0xff] }
  0x1b   :  { %68 = vperm.xlu1 %286, %v44_v6   ;;  %v238_v32 = vld [vmem:[%s413_s4] ss:$0 sm:$0xff] }
  0x1c   :  { %53 = vperm.xlu0 %285, %v44_v6   ;;  %261 = vmatpush3.bf16.msra.mxu0 %v289_v7  ;;  %v247_v37 = vld [vmem:[%s414_s5] ss:$0 sm:$0xff] }
  0x1d   :  { %262 = vmatprep.subr.bf16.mxu0 %v325_v3  ;;  %v248_v44 = vld [vmem:[#allocation2] ss:$0 sm:$0xff] }
  0x20   :  { %287 = vset.pattern.permute.xlu0 %v323_v1  ;;  %263 = vmatpush3.bf16.msra.mxu0 %v290_v8 }
  0x21   :  { %264 = vmatprep.subr.bf16.mxu0 %v325_v3 }
  0x24   :  { %265 = vmatpush3.bf16.msra.mxu0 %v291_v9 }
  0x25   :  { %266 = vmatprep.subr.bf16.mxu0 %v325_v3 }
  0x28   :  { %267 = vmatpush3.bf16.msra.mxu0 %v292_v10 }
  0x29   :  { %268 = vmatprep.subr.bf16.mxu0 %v325_v3 }
  0x2c   :  { %269 = vmatpush3.bf16.msra.mxu0 %v293_v11 }
  0x2d   :  { %270 = vmatprep.subr.bf16.mxu0 %v325_v3 }
  0x30   :  { %271 = vmatpush3.bf16.msra.mxu0 %v294_v12 }
  0x31   :  { %272 = vmatprep.subr.bf16.mxu0 %v325_v3 }
  0x34   :  { %273 = vmatpush3.bf16.msra.mxu0 %v295_v13 }
  0x96   :  { %v65_v16 = vpop.permute.xlu1 %64 }
  0x97   :  { %v49_v17 = vpop.permute.xlu0 %48  ;;  %v75_v18 = vmul.f32 %v236_v14, %v65_v16 }
  0x98   :  { %v60_v19 = vmul.f32 %v235_v15, %v49_v17 }
  0x9a   :  { %v77_v20 = vadd.f32 %v75_v18, %v60_v19  ;;  %v69_v22 = vpop.permute.xlu1 %68 }
  0x9b   :  { %v54_v23 = vpop.permute.xlu0 %53  ;;  %v76_v24 = vmul.f32 %v236_v14, %v69_v22 }
  0x9c   :  { %v61_v25 = vmul.f32 %v235_v15, %v54_v23  ;;  %v86_v26 = vadd.f32 %v237_v21, %v77_v20 }
  0x9e   :  { %v78_v27 = vadd.f32 %v76_v24, %v61_v25  ;;  %v88_v29 = vmax.f32 %v86_v26, 0.0 }
  0xa0   :  { %v87_v28 = vadd.f32 %v237_v21, %v78_v27 }
  0xa2   :  { %v89_v30 = vmax.f32 %v87_v28, 0.0 }
  0xa4   :  { %v90_v31 = vpack.c.bf16 %v89_v30, %v88_v29 }
  0xa6   :  { %275 = vmatmul.mubr.bf16.vlgmr.msra.gmra.mrb[0].mxu0 %v90_v31 }
 0x179   :  { %v196_v33 = vpop.f32.mrb[0].mxu0 }
 0x17a   :  { %v197_v34 = vadd.f32 %v238_v32, %v196_v33  ;;  %v276_v35 = vpop.f32.mrb[1].mxu0 }
 0x17b   :  { %v199_v36 = vpop.f32.mrb[2].mxu0 }
 0x17c   :  { %v203_v38 = vmax.f32 %v197_v34, 0.0  ;;  %v200_v39 = vadd.f32 %v238_v32, %v199_v36  ;;  %v277_v40 = vpop.f32.mrb[3].mxu0 }
 0x17e   :  { %v204_v41 = vmax.f32 %v200_v39, 0.0  ;;  %v212_v42 = vmul.f32 %v247_v37, %v203_v38 }
 0x180   :  { %214 = vadd.xlane.f32.xlu0 %v212_v42  ;;  %v213_v43 = vmul.f32 %v247_v37, %v204_v41 }
 0x182   :  { %216 = vadd.xlane.f32.xlu1 %v213_v43 }
 0x20d   :  { %v215_v45 = vpop.xlane.xlu0 %214 }
 0x20e   :  { %v225_v46 = vadd.f32 %v248_v44, %v215_v45 }
 0x20f   :  { %v217_v47 = vpop.xlane.xlu1 %216 }
 0x210   :  { %228 = vst.msk [vmem:[%s416_s7] sm:$0xff] %vm227_vm1, %v225_v46  ;;  %v226_v48 = vadd.f32 %v248_v44, %v217_v47 }
 0x212   :  { %229 = vst.msk [vmem:[%s416_s7 + $0x8] sm:$0xff] %vm227_vm1, %v226_v48 }
 0x213   :  { %234 = vsyncpa [#allocation4], 1 }

</bundles_post_ra>
